<compile_context>
chip_gen: v6e
topology: v6e:2x2x1
jax: 0.10.0
libtpu: 0.0.40
codegen_flags: <defaults>
</compile_context>

<pallas_src>
import math
import jax
import jax.numpy as jnp
from jax import lax
from jax.experimental import pallas as pl
from jax.experimental.pallas import tpu as pltpu


# ------------------------------ Pallas kernel -------------------------------

def _conv2l_kernel(x3_ref, a1_ref, a2_ref, s1_ref, s2_ref, shf_ref, ph_ref,
                   pw_ref, o_ref):
    """Fused conv1 -> BN1 -> ReLU -> conv2 -> BN2 -> +res -> ReLU -> maxpool(2,2).

    x3_ref : [M, 3*K1]   bf16  (M = Bblk*H rows; lanes = (kh, w, ci), H-pad folded)
    a1_ref : [3*K1, N]   bf16  (banded conv1 weights, BN1 scale folded)
    a2_ref : [3*N,  N]   bf16  (banded conv2 weights, BN2 scale folded)
    s1/s2  : [1, N]      f32   (folded BN shift, tiled over w)
    shf_ref: [2, M, M]   bf16  0/1 row-shift matrices (prev / next, item-bounded)
    ph_ref : [M, M]      bf16  0/1 H-pool row selector (even rows | odd rows)
    pw_ref : [N, 2*Np]   bf16  0/1 W-pool lane selector (even w | odd w)
    o_ref  : [Hp, Bblk*Np] f32 (Bblk items packed side-by-side along lanes)
    """
    M = x3_ref.shape[0]
    N = a1_ref.shape[1]
    Np = pw_ref.shape[1] // 2
    Hp = o_ref.shape[0]
    Bblk = o_ref.shape[1] // Np
    Mp = M // 2                       # total pooled rows (= Bblk * Hp)

    # ---- conv1 + BN1 shift + ReLU (single K-concatenated matmul) ----
    acc1 = jnp.dot(x3_ref[...], a1_ref[...], preferred_element_type=jnp.float32)
    y1 = jnp.maximum(acc1 + s1_ref[...], 0.0)                 # f32 [M, N]
    # conv1 residual skipped: in_channel != out_channel (PyTorch size() check).
    y1b = y1.astype(jnp.bfloat16)

    # ---- conv2 LHS: [y1[h-1] | y1[h] | y1[h+1]] along lanes.  Row shifts are
    # exact 0/1 matmuls with per-item boundary zeros baked in (no scratch).
    y1prev = jnp.dot(shf_ref[0], y1b,
                     preferred_element_type=jnp.float32).astype(jnp.bfloat16)
    y1next = jnp.dot(shf_ref[1], y1b,
                     preferred_element_type=jnp.float32).astype(jnp.bfloat16)
    cat = jnp.concatenate([y1prev, y1b, y1next], axis=-1)     # [M, 3N] bf16

    # ---- conv2 + BN2 shift + residual (f32 y1) + ReLU ----
    acc2 = jnp.dot(cat, a2_ref[...], preferred_element_type=jnp.float32)
    y2 = jnp.maximum(acc2 + s2_ref[...] + y1, 0.0)            # f32 [M, N]

    # ---- 2x2 max pool (even H/W, so ceil_mode == floor) ----
    y2b = y2.astype(jnp.bfloat16)
    t = jnp.dot(ph_ref[...], y2b, preferred_element_type=jnp.float32)   # [M, N]
    hmax = jnp.maximum(t[:Mp, :], t[Mp:, :])                            # [Mp, N]
    u = jnp.dot(hmax.astype(jnp.bfloat16), pw_ref[...],
                preferred_element_type=jnp.float32)                     # [Mp, 2Np]
    pooled = jnp.maximum(u[:, :Np], u[:, Np:])                          # [Mp, Np]

    # ---- pack Bblk items side-by-side along lanes -> lane-dense store ----
    o_ref[...] = jnp.concatenate(
        [pooled[i * Hp:(i + 1) * Hp, :] for i in range(Bblk)], axis=-1)


# --------------------------- host-side packing -------------------------------

def _fold_bn(bias, gamma, beta, mean, var, eps=1e-5):
    scale = gamma / jnp.sqrt(var + eps)
    shift = beta + (bias - mean) * scale
    return scale.astype(jnp.float32), shift.astype(jnp.float32)


def _banded_weight(w_oihw, scale, W):
    """Conv weight [Cout,Cin,3,3] (+ folded BN scale) -> banded [3, W*Cin, W*Cout].

    A[kh][win*Cin + ci, wout*Cout + co] = w[co, ci, kh, kw] * scale[co]
      with kw = win - wout + 1; out-of-band taps implement the zero padding in W.
    """
    Cout, Cin, KH, KW = w_oihw.shape
    wf = (w_oihw * scale[:, None, None, None]).astype(jnp.float32)
    D = jnp.stack([jnp.eye(W, W, k=1 - kw, dtype=jnp.float32) for kw in range(KW)])
    A = jnp.einsum("kvw,oihk->hviwo", D, wf)              # [3, W, Cin, W, Cout]
    return A.reshape(KH, W * Cin, W * Cout).astype(jnp.bfloat16)


def _row_shift_mats(Bblk, H):
    """0/1 row-shift matrices for conv2's kh=0 / kh=2 taps on the row-stacked
    activation: prev[m] = y[m-1], next[m] = y[m+1], zero at per-item H borders."""
    M = Bblk * H
    m = jnp.arange(M)
    prev = ((m[:, None] - 1) == m[None, :]) & ((m[:, None] % H) != 0)
    nxt = ((m[:, None] + 1) == m[None, :]) & ((m[:, None] % H) != H - 1)
    return jnp.stack([prev, nxt]).astype(jnp.bfloat16)


def _hpool_mat(M):
    """Row selector: output rows 0:M/2 pick even input rows, M/2:M the odd ones."""
    Mp = M // 2
    j = jnp.arange(Mp)
    P = jnp.zeros((M, M), jnp.float32)
    P = P.at[j, 2 * j].set(1.0)
    P = P.at[Mp + j, 2 * j + 1].set(1.0)
    return P.astype(jnp.bfloat16)


def _wpool_mat(W, C):
    """Lane selector: columns 0:Np gather even-w lane groups, Np:2Np the odd ones."""
    Wp = W // 2
    N, Np = W * C, Wp * C
    w = jnp.arange(Wp)[:, None]
    c = jnp.arange(C)[None, :]
    S = jnp.zeros((N, 2 * Np), jnp.float32)
    S = S.at[((2 * w) * C + c).reshape(-1), (w * C + c).reshape(-1)].set(1.0)
    S = S.at[((2 * w + 1) * C + c).reshape(-1),
             (Np + w * C + c).reshape(-1)].set(1.0)
    return S.astype(jnp.bfloat16)


def _update_len(xlen, k, s, p, ceil_mode=False):
    v = (xlen + 2 * p - k) / s + 1
    return int(math.ceil(v)) if ceil_mode else int(math.floor(v))


def conv2l_block_forward(xs, xlens, params, *, block_batch=8):
    """xs: [B, Cin, T, F] (NCHW).  Returns (ys [B, Cout, T//2, F//2], xlens')."""
    B, Cin, H, W = xs.shape
    Cout = params["w1"].shape[0]
    # TODO(synk): ceil_mode ragged last pool window for odd T/F not handled.
    assert H % 2 == 0 and W % 2 == 0
    Hp, Wp = H // 2, W // 2
    K1, N, Np = W * Cin, W * Cout, Wp * Cout

    Bblk = max(1, min(block_batch, B))          # items per grid step (M = Bblk*H)
    Bgrid = pl.cdiv(B, Bblk)
    Bpad = Bgrid * Bblk
    M = Bblk * H

    # activations: NHWC, zero-pad H, pack the three kh taps into lanes (bf16)
    x = jnp.transpose(xs, (0, 2, 3, 1))                        # [B, H, W, Cin]
    if Bpad != B:
        x = jnp.pad(x, ((0, Bpad - B), (0, 0), (0, 0), (0, 0)))
    xp = jnp.pad(x, ((0, 0), (1, 1), (0, 0), (0, 0)))          # [Bpad, H+2, W, Cin]
    x3 = jnp.concatenate(
        [xp[:, kh:kh + H].reshape(Bpad, H, K1) for kh in range(3)], axis=-1)
    x3 = x3.reshape(Bgrid, M, 3 * K1).astype(jnp.bfloat16)     # lanes = (kh, w, ci)

    # weights: fold BN scale, band over W, flatten kh into the K axis
    sc1, sh1 = _fold_bn(params["b1"], params["g1"], params["beta1"],
                        params["m1"], params["v1"])
    sc2, sh2 = _fold_bn(params["b2"], params["g2"], params["beta2"],
                        params["m2"], params["v2"])
    A1 = _banded_weight(params["w1"], sc1, W).reshape(3 * K1, N)   # bf16
    A2 = _banded_weight(params["w2"], sc2, W).reshape(3 * N, N)    # bf16
    s1v = jnp.tile(sh1, W).reshape(1, N).astype(jnp.float32)
    s2v = jnp.tile(sh2, W).reshape(1, N).astype(jnp.float32)

    shf = _row_shift_mats(Bblk, H)      # [2, M, M] bf16
    ph = _hpool_mat(M)                  # [M, M]    bf16
    pw = _wpool_mat(W, Cout)            # [N, 2*Np] bf16

    out = pl.pallas_call(
        _conv2l_kernel,
        out_shape=jax.ShapeDtypeStruct((Bgrid, Hp, Bblk * Np), jnp.float32),
        grid=(Bgrid,),
        in_specs=[
            pl.BlockSpec((None, M, 3 * K1), lambda g: (g, 0, 0)),   # x3 per group
            pl.BlockSpec((3 * K1, N), lambda g: (0, 0)),            # A1
            pl.BlockSpec((3 * N, N), lambda g: (0, 0)),             # A2
            pl.BlockSpec((1, N), lambda g: (0, 0)),                 # BN1 shift
            pl.BlockSpec((1, N), lambda g: (0, 0)),                 # BN2 shift
            pl.BlockSpec((2, M, M), lambda g: (0, 0, 0)),           # row shifts
            pl.BlockSpec((M, M), lambda g: (0, 0)),                 # H-pool sel
            pl.BlockSpec((N, 2 * Np), lambda g: (0, 0)),            # W-pool sel
        ],
        out_specs=pl.BlockSpec((None, Hp, Bblk * Np), lambda g: (g, 0, 0)),
        compiler_params=pltpu.CompilerParams(
            dimension_semantics=("parallel",)),
    )(x3, A1, A2, s1v, s2v, shf, ph, pw)

    # unpack: lane-packed items -> NCHW
    ys = out.reshape(Bgrid, Hp, Bblk, Wp, Cout)
    ys = ys.transpose(0, 2, 1, 3, 4).reshape(Bpad, Hp, Wp, Cout)[:B]
    ys = ys.transpose(0, 3, 1, 2)                                  # [B,Cout,Hp,Wp]

    xlens = [_update_len(t, 3, 1, 1) for t in xlens]                  # conv1
    xlens = [_update_len(t, 3, 1, 1) for t in xlens]                  # conv2
    xlens = [_update_len(t, 2, 2, 0, ceil_mode=True) for t in xlens]  # pool
    return ys, jnp.asarray(xlens, dtype=jnp.int32)


# ---------------------------- pure-JAX reference -----------------------------

def _reference(xs, params, eps=1e-5):
    def conv(x, w, b):
        y = lax.conv_general_dilated(x, w, (1, 1), ((1, 1), (1, 1)),
                                     dimension_numbers=("NCHW", "OIHW", "NCHW"),
                                     precision=lax.Precision.HIGHEST)
        return y + b[None, :, None, None]

    def bn(x, g, beta, m, v):
        return ((x - m[None, :, None, None]) / jnp.sqrt(v + eps)[None, :, None, None]
                * g[None, :, None, None] + beta[None, :, None, None])

    y = conv(xs, params["w1"], params["b1"])
    y = bn(y, params["g1"], params["beta1"], params["m1"], params["v1"])
    # conv1 residual skipped (channel mismatch, mirrors the PyTorch size() check)
    y = jnp.maximum(y, 0.0)
    r = y
    y = conv(y, params["w2"], params["b2"])
    y = bn(y, params["g2"], params["beta2"], params["m2"], params["v2"])
    y = y + r
    y = jnp.maximum(y, 0.0)
    y = lax.reduce_window(y, -jnp.inf, lax.max, (1, 1, 2, 2), (1, 1, 2, 2), "VALID")
    return y


# ----------------------------------- main -------------------------------------

if __name__ == "__main__":
    key = jax.random.PRNGKey(0)
    ks = jax.random.split(key, 14)

    B, Cin, T, Fdim = 2, 4, 16, 16
    Cout = 8

    params = {
        "w1": 0.1 * jax.random.normal(ks[0], (Cout, Cin, 3, 3), jnp.float32),
        "b1": 0.1 * jax.random.normal(ks[1], (Cout,), jnp.float32),
        "g1": 1.0 + 0.1 * jax.random.normal(ks[2], (Cout,), jnp.float32),
        "beta1": 0.1 * jax.random.normal(ks[3], (Cout,), jnp.float32),
        "m1": 0.1 * jax.random.normal(ks[4], (Cout,), jnp.float32),
        "v1": 0.5 + jnp.abs(jax.random.normal(ks[5], (Cout,), jnp.float32)),
        "w2": 0.1 * jax.random.normal(ks[6], (Cout, Cout, 3, 3), jnp.float32),
        "b2": 0.1 * jax.random.normal(ks[7], (Cout,), jnp.float32),
        "g2": 1.0 + 0.1 * jax.random.normal(ks[8], (Cout,), jnp.float32),
        "beta2": 0.1 * jax.random.normal(ks[9], (Cout,), jnp.float32),
        "m2": 0.1 * jax.random.normal(ks[10], (Cout,), jnp.float32),
        "v2": 0.5 + jnp.abs(jax.random.normal(ks[11], (Cout,), jnp.float32)),
    }

    xs = jax.random.normal(ks[12], (B, Cin, T, Fdim), jnp.float32)
    xlens = [16, 13]

    ys, out_lens = conv2l_block_forward(xs, xlens, params)
    ys = jax.block_until_ready(ys)

    ref = jax.block_until_ready(_reference(xs, params))
    assert ys.shape == (B, Cout, T // 2, Fdim // 2), ys.shape
    # tolerance reflects bf16 MXU operands (f32 accumulation) vs an f32 reference
    assert jnp.allclose(ys, ref, rtol=2e-2, atol=2e-2), \
        f"mismatch vs reference, max abs err {float(jnp.max(jnp.abs(ys - ref)))}"
    assert list(map(int, out_lens)) == [8, 7], out_lens

    print("KERNEL_OK")
</pallas_src>

<mosaic_0001>
module attributes {stable_mosaic.version = 11 : i64} {
  func.func @_conv2l_kernel(%arg0: i32, %arg1: memref<1x32x192xbf16, #tpu.memory_space<vmem>>, %arg2: memref<192x128xbf16, #tpu.memory_space<vmem>>, %arg3: memref<384x128xbf16, #tpu.memory_space<vmem>>, %arg4: memref<1x128xf32, #tpu.memory_space<vmem>>, %arg5: memref<1x128xf32, #tpu.memory_space<vmem>>, %arg6: memref<2x32x32xbf16, #tpu.memory_space<vmem>>, %arg7: memref<32x32xbf16, #tpu.memory_space<vmem>>, %arg8: memref<128x128xbf16, #tpu.memory_space<vmem>>, %arg9: memref<1x8x128xf32, #tpu.memory_space<vmem>>) attributes {dimension_semantics = [#tpu.dimension_semantics<parallel>], iteration_bounds = array<i64: 1>, scalar_prefetch = 0 : i64, scratch_operands = 0 : i64, tpu.core_type = #tpu.core_type<tc>, window_params = [{transform_indices = @transform_0, window_bounds = array<i64: 1, 32, 192>}, {pipeline_mode = #tpu.pipeline_mode<synchronous>, transform_indices = @transform_1, window_bounds = array<i64: 192, 128>}, {pipeline_mode = #tpu.pipeline_mode<synchronous>, transform_indices = @transform_2, window_bounds = array<i64: 384, 128>}, {pipeline_mode = #tpu.pipeline_mode<synchronous>, transform_indices = @transform_3, window_bounds = array<i64: 1, 128>}, {pipeline_mode = #tpu.pipeline_mode<synchronous>, transform_indices = @transform_4, window_bounds = array<i64: 1, 128>}, {pipeline_mode = #tpu.pipeline_mode<synchronous>, transform_indices = @transform_5, window_bounds = array<i64: 2, 32, 32>}, {pipeline_mode = #tpu.pipeline_mode<synchronous>, transform_indices = @transform_6, window_bounds = array<i64: 32, 32>}, {pipeline_mode = #tpu.pipeline_mode<synchronous>, transform_indices = @transform_7, window_bounds = array<i64: 128, 128>}, {transform_indices = @transform_8, window_bounds = array<i64: 1, 8, 128>}]} {
    %c0 = arith.constant 0 : index
    %c0_0 = arith.constant 0 : index
    %c0_1 = arith.constant 0 : index
    %0 = vector.load %arg1[%c0, %c0_0, %c0_1] : memref<1x32x192xbf16, #tpu.memory_space<vmem>>, vector<1x32x192xbf16>
    %1 = vector.shape_cast %0 : vector<1x32x192xbf16> to vector<32x192xbf16>
    %c0_2 = arith.constant 0 : index
    %c0_3 = arith.constant 0 : index
    %2 = vector.load %arg2[%c0_2, %c0_3] : memref<192x128xbf16, #tpu.memory_space<vmem>>, vector<192x128xbf16>
    %cst = arith.constant dense<0.000000e+00> : vector<32x128xf32>
    %3 = tpu.matmul %1, %2, %cst {dimension_numbers = #tpu.dot_dimension_numbers<[1], [0], [0], [1], [0, 0, 1, 1], [], []>} : vector<32x192xbf16>, vector<192x128xbf16>, vector<32x128xf32> -> vector<32x128xf32>
    %c0_4 = arith.constant 0 : index
    %c0_5 = arith.constant 0 : index
    %4 = vector.load %arg4[%c0_4, %c0_5] : memref<1x128xf32, #tpu.memory_space<vmem>>, vector<1x128xf32>
    %5 = vector.broadcast %4 : vector<1x128xf32> to vector<32x128xf32>
    %6 = arith.addf %3, %5 : vector<32x128xf32>
    %cst_6 = arith.constant 0.000000e+00 : f32
    %7 = vector.broadcast %cst_6 : f32 to vector<32x128xf32>
    %8 = arith.maximumf %6, %7 : vector<32x128xf32>
    %9 = arith.truncf %8 : vector<32x128xf32> to vector<32x128xbf16>
    %c0_7 = arith.constant 0 : index
    %c0_8 = arith.constant 0 : index
    %c0_9 = arith.constant 0 : index
    %10 = vector.load %arg6[%c0_7, %c0_8, %c0_9] : memref<2x32x32xbf16, #tpu.memory_space<vmem>>, vector<1x32x32xbf16>
    %11 = vector.shape_cast %10 : vector<1x32x32xbf16> to vector<32x32xbf16>
    %cst_10 = arith.constant dense<0.000000e+00> : vector<32x128xf32>
    %12 = tpu.matmul %11, %9, %cst_10 {dimension_numbers = #tpu.dot_dimension_numbers<[1], [0], [0], [1], [0, 0, 1, 1], [], []>} : vector<32x32xbf16>, vector<32x128xbf16>, vector<32x128xf32> -> vector<32x128xf32>
    %13 = arith.truncf %12 : vector<32x128xf32> to vector<32x128xbf16>
    %c1 = arith.constant 1 : index
    %c0_11 = arith.constant 0 : index
    %c0_12 = arith.constant 0 : index
    %14 = vector.load %arg6[%c1, %c0_11, %c0_12] : memref<2x32x32xbf16, #tpu.memory_space<vmem>>, vector<1x32x32xbf16>
    %15 = vector.shape_cast %14 : vector<1x32x32xbf16> to vector<32x32xbf16>
    %cst_13 = arith.constant dense<0.000000e+00> : vector<32x128xf32>
    %16 = tpu.matmul %15, %9, %cst_13 {dimension_numbers = #tpu.dot_dimension_numbers<[1], [0], [0], [1], [0, 0, 1, 1], [], []>} : vector<32x32xbf16>, vector<32x128xbf16>, vector<32x128xf32> -> vector<32x128xf32>
    %17 = arith.truncf %16 : vector<32x128xf32> to vector<32x128xbf16>
    %18 = tpu.concatenate %13, %9, %17 in 1 : vector<32x128xbf16>, vector<32x128xbf16>, vector<32x128xbf16> -> vector<32x384xbf16>
    %c0_14 = arith.constant 0 : index
    %c0_15 = arith.constant 0 : index
    %19 = vector.load %arg3[%c0_14, %c0_15] : memref<384x128xbf16, #tpu.memory_space<vmem>>, vector<384x128xbf16>
    %cst_16 = arith.constant dense<0.000000e+00> : vector<32x128xf32>
    %20 = tpu.matmul %18, %19, %cst_16 {dimension_numbers = #tpu.dot_dimension_numbers<[1], [0], [0], [1], [0, 0, 1, 1], [], []>} : vector<32x384xbf16>, vector<384x128xbf16>, vector<32x128xf32> -> vector<32x128xf32>
    %c0_17 = arith.constant 0 : index
    %c0_18 = arith.constant 0 : index
    %21 = vector.load %arg5[%c0_17, %c0_18] : memref<1x128xf32, #tpu.memory_space<vmem>>, vector<1x128xf32>
    %22 = vector.broadcast %21 : vector<1x128xf32> to vector<32x128xf32>
    %23 = arith.addf %20, %22 : vector<32x128xf32>
    %24 = arith.addf %23, %8 : vector<32x128xf32>
    %cst_19 = arith.constant 0.000000e+00 : f32
    %25 = vector.broadcast %cst_19 : f32 to vector<32x128xf32>
    %26 = arith.maximumf %24, %25 : vector<32x128xf32>
    %27 = arith.truncf %26 : vector<32x128xf32> to vector<32x128xbf16>
    %c0_20 = arith.constant 0 : index
    %c0_21 = arith.constant 0 : index
    %28 = vector.load %arg7[%c0_20, %c0_21] : memref<32x32xbf16, #tpu.memory_space<vmem>>, vector<32x32xbf16>
    %cst_22 = arith.constant dense<0.000000e+00> : vector<32x128xf32>
    %29 = tpu.matmul %28, %27, %cst_22 {dimension_numbers = #tpu.dot_dimension_numbers<[1], [0], [0], [1], [0, 0, 1, 1], [], []>} : vector<32x32xbf16>, vector<32x128xbf16>, vector<32x128xf32> -> vector<32x128xf32>
    %30 = vector.extract_strided_slice %29 {offsets = [0, 0], sizes = [16, 128], strides = [1, 1]} : vector<32x128xf32> to vector<16x128xf32>
    %31 = vector.extract_strided_slice %29 {offsets = [16, 0], sizes = [16, 128], strides = [1, 1]} : vector<32x128xf32> to vector<16x128xf32>
    %32 = arith.maximumf %30, %31 : vector<16x128xf32>
    %33 = arith.truncf %32 : vector<16x128xf32> to vector<16x128xbf16>
    %c0_23 = arith.constant 0 : index
    %c0_24 = arith.constant 0 : index
    %34 = vector.load %arg8[%c0_23, %c0_24] : memref<128x128xbf16, #tpu.memory_space<vmem>>, vector<128x128xbf16>
    %cst_25 = arith.constant dense<0.000000e+00> : vector<16x128xf32>
    %35 = tpu.matmul %33, %34, %cst_25 {dimension_numbers = #tpu.dot_dimension_numbers<[1], [0], [0], [1], [0, 0, 1, 1], [], []>} : vector<16x128xbf16>, vector<128x128xbf16>, vector<16x128xf32> -> vector<16x128xf32>
    %36 = vector.extract_strided_slice %35 {offsets = [0, 0], sizes = [16, 64], strides = [1, 1]} : vector<16x128xf32> to vector<16x64xf32>
    %37 = vector.extract_strided_slice %35 {offsets = [0, 64], sizes = [16, 64], strides = [1, 1]} : vector<16x128xf32> to vector<16x64xf32>
    %38 = arith.maximumf %36, %37 : vector<16x64xf32>
    %39 = vector.extract_strided_slice %38 {offsets = [0, 0], sizes = [8, 64], strides = [1, 1]} : vector<16x64xf32> to vector<8x64xf32>
    %40 = vector.extract_strided_slice %38 {offsets = [8, 0], sizes = [8, 64], strides = [1, 1]} : vector<16x64xf32> to vector<8x64xf32>
    %41 = tpu.concatenate %39, %40 in 1 : vector<8x64xf32>, vector<8x64xf32> -> vector<8x128xf32>
    %c0_26 = arith.constant 0 : index
    %c0_27 = arith.constant 0 : index
    %c0_28 = arith.constant 0 : index
    %42 = vector.load %arg9[%c0_26, %c0_27, %c0_28] : memref<1x8x128xf32, #tpu.memory_space<vmem>>, vector<1x8x128xf32>
    %43 = vector.shape_cast %42 : vector<1x8x128xf32> to vector<8x128xf32>
    %44 = vector.shape_cast %41 : vector<8x128xf32> to vector<1x8x128xf32>
    tpu.vector_store %arg9[%c0_26, %c0_27, %c0_28], %44 {strides = array<i32>} : memref<1x8x128xf32, #tpu.memory_space<vmem>>, vector<1x8x128xf32>,
    return
  }
  func.func @transform_0(%arg0: i32) -> (i32, i32, i32) {
    %c0_i32 = arith.constant 0 : i32
    %c0_i32_0 = arith.constant 0 : i32
    %c0_i32_1 = arith.constant 0 : i32
    return %arg0, %c0_i32, %c0_i32_0 : i32, i32, i32
  }
  func.func @transform_1(%arg0: i32) -> (i32, i32) {
    %c0_i32 = arith.constant 0 : i32
    %c0_i32_0 = arith.constant 0 : i32
    %c0_i32_1 = arith.constant 0 : i32
    return %c0_i32, %c0_i32_0 : i32, i32
  }
  func.func @transform_2(%arg0: i32) -> (i32, i32) {
    %c0_i32 = arith.constant 0 : i32
    %c0_i32_0 = arith.constant 0 : i32
    %c0_i32_1 = arith.constant 0 : i32
    return %c0_i32, %c0_i32_0 : i32, i32
  }
  func.func @transform_3(%arg0: i32) -> (i32, i32) {
    %c0_i32 = arith.constant 0 : i32
    %c0_i32_0 = arith.constant 0 : i32
    %c0_i32_1 = arith.constant 0 : i32
    return %c0_i32, %c0_i32_0 : i32, i32
  }
  func.func @transform_4(%arg0: i32) -> (i32, i32) {
    %c0_i32 = arith.constant 0 : i32
    %c0_i32_0 = arith.constant 0 : i32
    %c0_i32_1 = arith.constant 0 : i32
    return %c0_i32, %c0_i32_0 : i32, i32
  }
  func.func @transform_5(%arg0: i32) -> (i32, i32, i32) {
    %c0_i32 = arith.constant 0 : i32
    %c0_i32_0 = arith.constant 0 : i32
    %c0_i32_1 = arith.constant 0 : i32
    %c0_i32_2 = arith.constant 0 : i32
    return %c0_i32, %c0_i32_0, %c0_i32_1 : i32, i32, i32
  }
  func.func @transform_6(%arg0: i32) -> (i32, i32) {
    %c0_i32 = arith.constant 0 : i32
    %c0_i32_0 = arith.constant 0 : i32
    %c0_i32_1 = arith.constant 0 : i32
    return %c0_i32, %c0_i32_0 : i32, i32
  }
  func.func @transform_7(%arg0: i32) -> (i32, i32) {
    %c0_i32 = arith.constant 0 : i32
    %c0_i32_0 = arith.constant 0 : i32
    %c0_i32_1 = arith.constant 0 : i32
    return %c0_i32, %c0_i32_0 : i32, i32
  }
  func.func @transform_8(%arg0: i32) -> (i32, i32, i32) {
    %c0_i32 = arith.constant 0 : i32
    %c0_i32_0 = arith.constant 0 : i32
    %c0_i32_1 = arith.constant 0 : i32
    return %arg0, %c0_i32, %c0_i32_0 : i32, i32, i32
  }
}

</mosaic_0001>

<bundles_post_ra>
// kernel: tpu_custom_call.1
= control target key start
LH: loop header
LB: loop body
LE: loop exit
PB: predicated region body
PF: predicated region fallthrough
CT: control target
= control target key end

     0   :  { %13 = vsyncpa [#allocation3], 0  ;;  %s1526_s0 = inlined_call_operand.hbm [shape: bf16[1,32,192], index: 0, kind: input, shape index: {}]   ;;  %s1527_s1 = inlined_call_operand.hbm [shape: bf16[192,128], index: 1, kind: input, shape index: {}]   ;;  %s1528_s2 = inlined_call_operand.hbm [shape: bf16[384,128], index: 2, kind: input, shape index: {}]   ;;  %s1529_s3 = inlined_call_operand.vmem [shape: f32[1,128], index: 3, kind: input, shape index: {}]   ;;  %s1530_s4 = inlined_call_operand.vmem [shape: f32[1,128], index: 4, kind: input, shape index: {}]   ;;  %s1531_s5 = inlined_call_operand.hbm [shape: bf16[2,32,32], index: 5, kind: input, shape index: {}]   ;;  %s1532_s6 = inlined_call_operand.hbm [shape: bf16[32,32], index: 6, kind: input, shape index: {}]   ;;  %s1533_s7 = inlined_call_operand.hbm [shape: bf16[128,128], index: 7, kind: input, shape index: {}]   ;;  %s1534_s8 = inlined_call_operand.hbm [shape: f32[1,8,128], index: 8, kind: output, shape index: {}]  }
   0x1   :  { %14 = vsyncpa [#allocation6], 0 }
   0x2   :  { %15 = vsyncpa [#allocation9], 0 }
   0x3   :  { %16 = vsyncpa [#allocation12], 0 }
   0x4   :  { %17 = vsyncpa [#allocation4], 0  ;;  %s1369_s27 = smov [#allocation5]  }
   0x5   :  { %s35_s28 = sshll.u32 %s1369_s27, 4  ;;  %s36_s28 = int_to_ptr.vmem [resolvable:$true] %s35_s28 }
   0x6   :  { %s1227_s29 = scalar_lea.vmem %s36_s28, 1536  ;;  %p1232_p1 = scmp.lt.s32.totalorder %s36_s28, %s36_s28 }
   0x7   :  { %p1228_p0 = scmp.ne.s32.totalorder %s36_s28, %s1227_s29  ;;  %p1233_p2 = scmp.lt.s32.totalorder %s1227_s29, %s1227_s29 }
   0x9   :  { %p1234_p3 = por %p1233_p2, %p1232_p1 }
   0xb   :  { %p1235_p4 = pnand %p1234_p3, %p1228_p0 }
   0xd   :  { %1238 = shalt.err (!%p1235_p4)
}
   0xe   :  { %s1370_s30 = smov 64   ;;  %s1371_s9 = smov 4  }
   0xf   :  { %41 = dma.hbm_to_vmem [thread:$0]  %s1527_s1, 1536, %s36_s28, [#allocation6], %s1370_s30, %s1370_s30, %s1371_s9  }
  0x10   :  { %s1372_s12 = smov [#allocation8]   ;;  %s1373_s14 = smov [#allocation2]  }
  0x11   :  { %s63_s13 = sshll.u32 %s1372_s12, 4  ;;  %s23_s15 = sshll.u32 %s1373_s14, 4  ;;  %s64_s13 = int_to_ptr.vmem [resolvable:$true] %s63_s13  ;;  %s24_s15 = int_to_ptr.vmem [resolvable:$true] %s23_s15 }
  0x12   :  { %s1247_s16 = scalar_lea.vmem %s64_s13, 512  ;;  %p1252_p6 = scmp.lt.s32.totalorder %s64_s13, %s64_s13 }
  0x13   :  { %p1248_p5 = scmp.ne.s32.totalorder %s64_s13, %s1247_s16  ;;  %p1253_p7 = scmp.lt.s32.totalorder %s1247_s16, %s1247_s16 }
  0x15   :  { %p1254_p8 = por %p1253_p7, %p1252_p6 }
  0x17   :  { %p1255_p9 = pnand %p1254_p8, %p1248_p5 }
  0x19   :  { %1258 = shalt.err (!%p1255_p9)
}
  0x1a   :  { %69 = dma.hbm_to_vmem [thread:$0]  %s1531_s5, 512, %s64_s13, [#allocation9], %s1370_s30, %s1370_s30, %s1371_s9  }
  0x1b   :  { %s1267_s1 = scalar_lea.vmem %s24_s15, 512  ;;  %p1272_p11 = scmp.lt.s32.totalorder %s24_s15, %s24_s15 }
  0x1c   :  { %p1268_p10 = scmp.ne.s32.totalorder %s24_s15, %s1267_s1  ;;  %p1273_p12 = scmp.lt.s32.totalorder %s1267_s1, %s1267_s1 }
  0x1e   :  { %p1274_p13 = por %p1273_p12, %p1272_p11 }
  0x20   :  { %p1275_p0 = pnand %p1274_p13, %p1268_p10 }
  0x22   :  { %1278 = shalt.err (!%p1275_p0)
}
  0x23   :  { %s1374_s19 = smov 128   ;;  %s1375_s20 = smov 8  }
  0x24   :  { %29 = dma.hbm_to_vmem [thread:$0]  %s1526_s0, 512, %s24_s15, [#allocation3], %s1374_s19, %s1374_s19, %s1375_s20  }
  0x25   :  { %s1376_s23 = smov [#allocation7]   ;;  %s1377_s25 = smov [#allocation10]  }
  0x26   :  { %s47_s24 = sshll.u32 %s1376_s23, 4  ;;  %s75_s26 = sshll.u32 %s1377_s25, 4  ;;  %s48_s24 = int_to_ptr.vmem [resolvable:$true] %s47_s24  ;;  %s76_s26 = int_to_ptr.vmem [resolvable:$true] %s75_s26 }
  0x27   :  { %s1287_s5 = scalar_lea.vmem %s48_s24, 3072  ;;  %p1292_p2 = scmp.lt.s32.totalorder %s48_s24, %s48_s24 }
  0x28   :  { %p1288_p1 = scmp.ne.s32.totalorder %s48_s24, %s1287_s5  ;;  %p1293_p3 = scmp.lt.s32.totalorder %s1287_s5, %s1287_s5 }
  0x2a   :  { %p1294_p4 = por %p1293_p3, %p1292_p2 }
  0x2c   :  { %p1295_p5 = pnand %p1294_p4, %p1288_p1 }
  0x2e   :  { %1298 = shalt.err (!%p1295_p5)
}
  0x2f   :  { %53 = dma.hbm_to_vmem [thread:$0]  %s1528_s2, 3072, %s48_s24, [#allocation6], %s1370_s30, %s1370_s30, %s1371_s9  }
  0x30   :  { %s1307_s0 = scalar_lea.vmem %s76_s26, 256  ;;  %p1312_p7 = scmp.lt.s32.totalorder %s76_s26, %s76_s26 }
  0x31   :  { %p1308_p6 = scmp.ne.s32.totalorder %s76_s26, %s1307_s0  ;;  %p1313_p8 = scmp.lt.s32.totalorder %s1307_s0, %s1307_s0 }
  0x33   :  { %p1314_p9 = por %p1313_p8, %p1312_p7 }
  0x35   :  { %p1315_p10 = pnand %p1314_p9, %p1308_p6 }
  0x37   :  { %1318 = shalt.err (!%p1315_p10)
}
  0x38   :  { %81 = dma.hbm_to_vmem [thread:$0]  %s1532_s6, 256, %s76_s26, [#allocation9], %s1370_s30, %s1370_s30, %s1371_s9  }
  0x39   :  { %s1378_s11 = smov [#allocation11]  }
  0x3a   :  { %s87_s12 = sshll.u32 %s1378_s11, 4  ;;  %s88_s12 = int_to_ptr.vmem [resolvable:$true] %s87_s12 }
  0x3b   :  { %s1327_s13 = scalar_lea.vmem %s88_s12, 1024  ;;  %p1332_p12 = scmp.lt.s32.totalorder %s88_s12, %s88_s12 }
  0x3c   :  { %p1328_p11 = scmp.ne.s32.totalorder %s88_s12, %s1327_s13  ;;  %p1333_p13 = scmp.lt.s32.totalorder %s1327_s13, %s1327_s13 }
  0x3e   :  { %p1334_p0 = por %p1333_p13, %p1332_p12 }
  0x40   :  { %p1335_p1 = pnand %p1334_p0, %p1328_p11 }
  0x42   :  { %1338 = shalt.err (!%p1335_p1)
}
  0x43   :  { %93 = dma.hbm_to_vmem [thread:$0]  %s1533_s7, 1024, %s88_s12, [#allocation12], %s1370_s30, %s1370_s30, %s1371_s9  }
  0x44   :  { %1359 = dma.done.wait [#allocation3], 512  }
  0x45   :  { %1360 = vsyncadd [#allocation3], 4294966784 }
  0x46   :  { %1361 = dma.done.wait [#allocation6], 4608  }
  0x47   :  { %1362 = vsyncadd [#allocation6], 4294962688 }
  0x48   :  { %1363 = dma.done.wait [#allocation9], 768  }
  0x49   :  { %1364 = vsyncadd [#allocation9], 4294966528 }
  0x4a   :  { %1365 = dma.done.wait [#allocation12], 1024  }
  0x4b   :  { %1366 = vsyncadd [#allocation12], 4294966272  ;;  %v1379_v0 = vmov 0   ;;  %v1163_v1 = vld [vmem:[#allocation5 + $0x38] sm:$0xff]   ;;  %v1164_v2 = vld [vmem:[#allocation5 + $0x30] sm:$0xff]   ;;  %vm238_vm0 = vcmask 523264  }
  0x4c   :  { %245 = vmatprep.subr.bf16.mxu0 %v1379_v0  ;;  %v1165_v3 = vld [vmem:[#allocation5 + $0x28] sm:$0xff]   ;;  %v1166_v4 = vld [vmem:[#allocation5 + $0x20] sm:$0xff]   ;;  %v1167_v6 = vld [vmem:[#allocation5 + $0x18] sm:$0xff]   ;;  %vm314_vm1 = vcmask 261120   ;;  %vm1381_vm2 = vmmov 0  }
  0x4d   :  { %246 = vmatpush1.bf16.msra.mxu0 %v1163_v1  ;;  %v1177_v5 = vld [vmem:[#allocation2 + $0x4] ss:$8 sps:$4 sm:$0xff]   ;;  %v1168_v7 = vld [vmem:[#allocation5 + $0x10] sm:$0xff]   ;;  %v1171_v10 = vld [vmem:[#allocation5 + $0x58] sm:$0xff]  }
  0x4e   :  { %247 = vmatprep.subr.bf16.mxu0 %v1379_v0  ;;  %979 = vmatprep.mubr.msk.bf16.mxu0 %vm238_vm0, %v1177_v5  ;;  %v1169_v8 = vld [vmem:[#allocation5 + $0x8] sm:$0xff]   ;;  %v1170_v9 = vld [vmem:[#allocation5] sm:$0xff]   ;;  %v1172_v11 = vld [vmem:[#allocation5 + $0x50] sm:$0xff]  }
  0x4f   :  { %v1173_v12 = vld [vmem:[#allocation5 + $0x48] sm:$0xff]   ;;  %v1174_v13 = vld [vmem:[#allocation5 + $0x40] sm:$0xff]   ;;  %v1178_v15 = vld [vmem:[#allocation2 + $0x14] ss:$8 sps:$4 sm:$0xff]  }
  0x50   :  { %v1175_v14 = vld [vmem:[#allocation2] ss:$8 sps:$4 sm:$0xff]   ;;  %v1180_v16 = vld [vmem:[#allocation2 + $0x10] ss:$8 sps:$4 sm:$0xff]  }
  0x51   :  { %248 = vmatpush1.bf16.msra.mxu0 %v1164_v2  ;;  %v1181_v17 = vld [vmem:[#allocation8] sm:$0xff]   ;;  %v1191_v18 = vld [vmem:[#allocation7 + $0xb8] sm:$0xff]   ;;  %v1194_v19 = vld [vmem:[#allocation7 + $0xb0] sm:$0xff]  }
  0x52   :  { %249 = vmatprep.subr.bf16.mxu0 %v1379_v0  ;;  %1089 = vmatprep.mubr.msk.bf16.mxu1 %vm314_vm1, %v1181_v17  ;;  %v1197_v20 = vld [vmem:[#allocation7 + $0xa8] sm:$0xff]   ;;  %v1200_v21 = vld [vmem:[#allocation7 + $0xa0] sm:$0xff]   ;;  %v1183_v42 = vld [vmem:[#allocation8 + $0x10] sm:$0xff]  }
  0x53   :  { %v962_v27 = vld [vmem:[%s1529_s3] ss:$0 sm:$0xff]  ;;  %v1182_v41 = vld [vmem:[#allocation8 + $0x8] sm:$0xff]   ;;  %v1185_v43 = vld [vmem:[#allocation7 + $0x78] sm:$0xff]  }
  0x54   :  { %v1184_v44 = vld [vmem:[#allocation8 + $0x18] sm:$0xff]   ;;  %v1187_v46 = vld [vmem:[#allocation7 + $0x70] sm:$0xff]   ;;  %v1189_v48 = vld [vmem:[#allocation7 + $0x68] sm:$0xff]  }
  0x55   :  { %250 = vmatpush1.bf16.msra.mxu0 %v1165_v3  ;;  %v1186_v45 = vld [vmem:[#allocation7 + $0x38] sm:$0xff]   ;;  %v1188_v47 = vld [vmem:[#allocation7 + $0x30] sm:$0xff]   ;;  %v1190_v49 = vld [vmem:[#allocation7 + $0x28] sm:$0xff]  }
  0x56   :  { %251 = vmatprep.subr.bf16.mxu0 %v1379_v0  ;;  %v1192_v50 = vld [vmem:[#allocation7 + $0x60] sm:$0xff]   ;;  %v1195_v52 = vld [vmem:[#allocation7 + $0x58] sm:$0xff]   ;;  %v1198_v54 = vld [vmem:[#allocation7 + $0x50] sm:$0xff]  }
  0x57   :  { %v1193_v51 = vld [vmem:[#allocation7 + $0x20] sm:$0xff]   ;;  %v1196_v53 = vld [vmem:[#allocation7 + $0x18] sm:$0xff]   ;;  %v1199_v55 = vld [vmem:[#allocation7 + $0x10] sm:$0xff]  }
  0x58   :  { %v1201_v56 = vld [vmem:[#allocation7 + $0x48] sm:$0xff]   ;;  %v1203_v58 = vld [vmem:[#allocation7 + $0x98] sm:$0xff]   ;;  %v1204_v59 = vld [vmem:[#allocation7 + $0x40] sm:$0xff]  }
  0x59   :  { %252 = vmatpush1.bf16.msra.mxu0 %v1166_v4  ;;  %v1202_v57 = vld [vmem:[#allocation7 + $0x8] sm:$0xff]   ;;  %v1205_v60 = vld [vmem:[#allocation7] sm:$0xff]   ;;  %v1206_v61 = vld [vmem:[#allocation7 + $0x90] sm:$0xff]  }
  0x5a   :  { %253 = vmatprep.subr.bf16.mxu0 %v1379_v0  ;;  %v1207_v62 = vld [vmem:[#allocation7 + $0x88] sm:$0xff]   ;;  %v1208_v63 = vld [vmem:[#allocation7 + $0x80] sm:$0xff]   ;;  %v1214_v17 = vld [vmem:[#allocation11 + $0x20] sm:$0xff]  }
  0x5d   :  { %254 = vmatpush1.bf16.msra.mxu0 %v1167_v6 }
  0x5e   :  { %255 = vmatprep.subr.bf16.mxu0 %v1379_v0 }
  0x61   :  { %256 = vmatpush1.bf16.msra.mxu0 %v1168_v7 }
  0x62   :  { %257 = vmatprep.subr.bf16.mxu0 %v1379_v0 }
  0x65   :  { %258 = vmatpush1.bf16.msra.mxu0 %v1169_v8 }
  0x66   :  { %259 = vmatprep.subr.bf16.mxu0 %v1379_v0 }
  0x69   :  { %260 = vmatpush1.bf16.msra.mxu0 %v1170_v9 }
  0x6a   :  { %269 = vmatprep.subr.bf16.mxu0 %v1379_v0 }
  0x6d   :  { %270 = vmatpush2.bf16.msra.mxu0 %v1171_v10 }
  0x6e   :  { %271 = vmatprep.subr.bf16.mxu0 %v1379_v0 }
  0x71   :  { %272 = vmatpush2.bf16.msra.mxu0 %v1172_v11 }
  0x72   :  { %273 = vmatprep.subr.bf16.mxu0 %v1379_v0 }
  0x75   :  { %274 = vmatpush2.bf16.msra.mxu0 %v1173_v12  ;;  %v1209_v12 = vld [vmem:[#allocation10] sm:$0xff]  }
  0x76   :  { %275 = vmatprep.subr.bf16.mxu0 %v1379_v0 }
  0x79   :  { %276 = vmatpush2.bf16.msra.mxu0 %v1174_v13  ;;  %v1211_v13 = vld [vmem:[#allocation11 + $0x38] sm:$0xff]  }
  0x7a   :  { %1101 = vmatprep.subr.bf16.mxu0 %v1191_v18 }
  0x7c   :  { %278 = vmatmul.mubr.bf16.vlgmr.msra.gmra.mxu0 %v1175_v14  ;;  %v1380_v14 = vmov 0.0  }
  0x7d   :  { %980 = vmatprep.mubr.msk.bf16.mxu0 %vm238_vm0, %v1178_v15  ;;  %1102 = vmatpush3.bf16.msra.mxu0 %v1191_v18  ;;  %v1212_v15 = vld [vmem:[#allocation11 + $0x30] sm:$0xff]   ;;  %v1215_v18 = vld [vmem:[#allocation11 + $0x18] sm:$0xff]  }
  0x7e   :  { %1103 = vmatprep.subr.bf16.mxu0 %v1194_v19 }
  0x81   :  { %1104 = vmatpush3.bf16.msra.mxu0 %v1194_v19 }
  0x82   :  { %1105 = vmatprep.subr.bf16.mxu0 %v1197_v20 }
  0x84   :  { %286 = vmatmul.mubr.bf16.gmra.mxu0 %v1180_v16  ;;  %v1213_v16 = vld [vmem:[#allocation11 + $0x28] sm:$0xff]  }
  0x85   :  { %1106 = vmatpush3.bf16.msra.mxu0 %v1197_v20 }
  0x86   :  { %1107 = vmatprep.subr.bf16.mxu0 %v1200_v21 }
  0x89   :  { %1108 = vmatpush3.bf16.msra.mxu0 %v1200_v21 }
  0x8a   :  { %1109 = vmatprep.subr.bf16.mxu0 %v1203_v58 }
  0x8d   :  { %1110 = vmatpush3.bf16.msra.mxu0 %v1203_v58 }
  0x8e   :  { %1111 = vmatprep.subr.bf16.mxu0 %v1206_v61 }
  0x91   :  { %1112 = vmatpush3.bf16.msra.mxu0 %v1206_v61 }
  0x92   :  { %1113 = vmatprep.subr.bf16.mxu0 %v1207_v62 }
  0x95   :  { %1114 = vmatpush3.bf16.msra.mxu0 %v1207_v62 }
  0x96   :  { %1115 = vmatprep.subr.bf16.mxu0 %v1208_v63 }
  0x99   :  { %1116 = vmatpush3.bf16.msra.mxu0 %v1208_v63 }
 0x13c   :  { %v279_v22 = vpop.f32.mrf.mxu0 }
 0x13d   :  { %v1471_v32 = vadd.f32 %v962_v27, %v279_v22 }
 0x13e   :  { %v281_v23 = vpop.f32.mrf.mxu0 }
 0x13f   :  { %v294_v38 = vmax.f32 %v1471_v32, 0.0  ;;  %v1217_v32 = vld [vmem:[#allocation11 + $0x8] sm:$0xff]  }
 0x140   :  { %v282_v24 = vpop.f32.mrf.mxu0 }
 0x141   :  { %v1467_v29 = vadd.f32 %v962_v27, %v282_v24 }
 0x142   :  { %v284_v25 = vpop.f32.mrf.mxu0 }
 0x143   :  { %v295_v35 = vmax.f32 %v1467_v29, 0.0  ;;  %v1210_v29 = vld [vmem:[#allocation10 + $0x8] sm:$0xff]  }
 0x144   :  { %v287_v26 = vpop.f32.mrf.mxu0 }
 0x145   :  { %v1469_v30 = vadd.f32 %v962_v27, %v287_v26  ;;  %v298_v40 = vpack.c.bf16 %v295_v35, %v294_v38 }
 0x146   :  { %v289_v28 = vpop.f32.mrf.mxu0 }
 0x147   :  { %v296_v36 = vmax.f32 %v1469_v30, 0.0  ;;  %v1216_v30 = vld [vmem:[#allocation11 + $0x10] sm:$0xff]  }
 0x148   :  { %v290_v31 = vpop.f32.mrf.mxu0 }
 0x149   :  { %v1473_v33 = vadd.f32 %v962_v27, %v290_v31 }
 0x14a   :  { %v292_v34 = vpop.f32.mrf.mxu0 }
 0x14b   :  { %v297_v37 = vmax.f32 %v1473_v33, 0.0  ;;  %v989_v34 = vld [vmem:[%s1530_s4] ss:$0 sm:$0xff]  ;;  %v1218_v33 = vld [vmem:[#allocation11] sm:$0xff]   ;;  %s1382_s4 = smov [#allocation13]  }
 0x14c   :  { %s950_s15 = sshll.u32 %s1382_s4, 4  ;;  %s951_s15 = int_to_ptr.vmem [resolvable:$true] %s950_s15 }
 0x14d   :  { %v1483_v39 = vpack.c.bf16 %v297_v37, %v296_v36  ;;  %s1339_s16 = scalar_lea.vmem %s951_s15, 128  ;;  %p1344_p3 = scmp.lt.s32.totalorder %s951_s15, %s951_s15 }
 0x14e   :  { %p1340_p2 = scmp.ne.s32.totalorder %s951_s15, %s1339_s16  ;;  %p1345_p4 = scmp.lt.s32.totalorder %s1339_s16, %s1339_s16 }
 0x14f   :  { %1085 = vmatprep.subr.bf16.mxu1 %v1483_v39 }
 0x150   :  { %1086 = vmatpush3.bf16.msra.mxu1 %v1483_v39  ;;  %p1346_p5 = por %p1345_p4, %p1344_p3 }
 0x151   :  { %1087 = vmatprep.subr.bf16.mxu1 %v298_v40 }
 0x152   :  { %p1347_p6 = pnand %p1346_p5, %p1340_p2 }
 0x154   :  { %1088 = vmatpush3.bf16.msra.mxu1 %v298_v40 }
 0x155   :  { %1093 = vmatprep.subr.bf16.mxu1 %v1483_v39 }
 0x157   :  { %1090 = vmatmul.mubr.msk.bf16.vlgmr.msra.gmra.mxu1 %vm314_vm1, %v1182_v41 }
 0x158   :  { %1094 = vmatpush3.bf16.msra.mxu1 %v1483_v39  ;;  %1097 = vmatprep.mubr.msk.bf16.mxu1 %vm314_vm1, %v1183_v42 }
 0x159   :  { %1095 = vmatprep.subr.bf16.mxu1 %v298_v40 }
 0x15c   :  { %1096 = vmatpush3.bf16.msra.mxu1 %v298_v40 }
 0x15d   :  { %1034 = vmatprep.subr.bf16.mxu1 %v1185_v43 }
 0x15f   :  { %1098 = vmatmul.mubr.msk.bf16.vlgmr.msra.gmra.mxu1 %vm314_vm1, %v1184_v44 }
 0x160   :  { %675 = vmatprep.mubr.bf16.mxu1 %v298_v40  ;;  %1035 = vmatpush3.bf16.msra.mxu1 %v1186_v45 }
 0x161   :  { %1036 = vmatprep.subr.bf16.mxu1 %v1187_v46 }
 0x164   :  { %1037 = vmatpush3.bf16.msra.mxu1 %v1188_v47 }
 0x165   :  { %1038 = vmatprep.subr.bf16.mxu1 %v1189_v48 }
 0x168   :  { %1039 = vmatpush3.bf16.msra.mxu1 %v1190_v49 }
 0x169   :  { %1040 = vmatprep.subr.bf16.mxu1 %v1192_v50 }
 0x16c   :  { %1041 = vmatpush3.bf16.msra.mxu1 %v1193_v51 }
 0x16d   :  { %1042 = vmatprep.subr.bf16.mxu1 %v1195_v52 }
 0x170   :  { %1043 = vmatpush3.bf16.msra.mxu1 %v1196_v53 }
 0x171   :  { %1044 = vmatprep.subr.bf16.mxu1 %v1198_v54 }
 0x174   :  { %1045 = vmatpush3.bf16.msra.mxu1 %v1199_v55 }
 0x175   :  { %1046 = vmatprep.subr.bf16.mxu1 %v1201_v56 }
 0x178   :  { %1047 = vmatpush3.bf16.msra.mxu1 %v1202_v57 }
 0x179   :  { %1048 = vmatprep.subr.bf16.mxu1 %v1204_v59 }
 0x17c   :  { %1049 = vmatpush3.bf16.msra.mxu1 %v1205_v60 }
 0x17d   :  { %1129 = vmatprep.subr.bf16.mxu1 %v1380_v14 }
 0x217   :  { %v1091_v0 = vpop.f32.mrf.mxu1 }
 0x219   :  { %v355_v1 = vpop.f32.mrf.mxu1 }
 0x21b   :  { %v1092_v2 = vpop.f32.mrf.mxu1 }
 0x21c   :  { %v371_v9 = vpack.c.bf16 %v1092_v2, %v1091_v0 }
 0x21d   :  { %v358_v3 = vpop.f32.mrf.mxu1 }
 0x21e   :  { %v370_v4 = vpack.c.bf16 %v358_v3, %v355_v1 }
 0x21f   :  { %v1099_v5 = vpop.f32.mrf.mxu1 }
 0x220   :  { %676 = vmatmul.mubr.bf16.vlgmr.msra.gmra.mxu1 %v370_v4 }
 0x221   :  { %v427_v6 = vpop.f32.mrf.mxu1  ;;  %683 = vmatprep.mubr.bf16.mxu1 %v1483_v39  ;;  %1130 = vmatpush3.bf16.msra.mxu1 %v1211_v13 }
 0x222   :  { %1131 = vmatprep.subr.bf16.mxu1 %v1380_v14 }
 0x223   :  { %v1100_v7 = vpop.f32.mrf.mxu1 }
 0x224   :  { %v443_v11 = vpack.c.bf16 %v1100_v7, %v1099_v5 }
 0x225   :  { %v430_v8 = vpop.f32.mrf.mxu1  ;;  %1132 = vmatpush3.bf16.msra.mxu1 %v1212_v15 }
 0x226   :  { %v442_v10 = vpack.c.bf16 %v430_v8, %v427_v6  ;;  %1133 = vmatprep.subr.bf16.mxu1 %v1380_v14 }
 0x228   :  { %684 = vmatmul.mubr.bf16.gmra.mxu1 %v371_v9  ;;  %1117 = vmatprep.mubr.bf16.mxu0 %v442_v10 }
 0x229   :  { %1118 = vmatmul.mubr.bf16.vlgmr.msra.gmra.mxu0 %v443_v11  ;;  %1134 = vmatpush3.bf16.msra.mxu1 %v1213_v16 }
 0x22a   :  { %1125 = vmatprep.mubr.msk.bf16.mxu0 %vm314_vm1, %v1209_v12  ;;  %1135 = vmatprep.subr.bf16.mxu1 %v1380_v14 }
 0x22b   :  { %1145 = vmatprep.mubr.msk.bf16.mxu1 %vm1381_vm2, %v1380_v14 }
 0x22d   :  { %1136 = vmatpush3.bf16.msra.mxu1 %v1214_v17 }
 0x22e   :  { %1137 = vmatprep.subr.bf16.mxu1 %v1380_v14 }
 0x231   :  { %1138 = vmatpush3.bf16.msra.mxu1 %v1215_v18 }
 0x232   :  { %1139 = vmatprep.subr.bf16.mxu1 %v1380_v14 }
 0x235   :  { %1140 = vmatpush3.bf16.msra.mxu1 %v1216_v30 }
 0x236   :  { %1141 = vmatprep.subr.bf16.mxu1 %v1380_v14 }
 0x239   :  { %1142 = vmatpush3.bf16.msra.mxu1 %v1217_v32 }
 0x23a   :  { %1143 = vmatprep.subr.bf16.mxu1 %v1380_v14 }
 0x23d   :  { %1144 = vmatpush3.bf16.msra.mxu1 %v1218_v33 }
 0x2e0   :  { %v1050_v19 = vpop.f32.mrf.mxu1 }
 0x2e2   :  { %v1051_v20 = vpop.f32.mrf.mxu1 }
 0x2e3   :  { %v1052_v27 = vadd.f32 %v1051_v20, %v1050_v19 }
 0x2e4   :  { %v1053_v21 = vpop.f32.mrf.mxu1 }
 0x2e5   :  { %v678_v45 = vadd.f32 %v1052_v27, %v989_v34 }
 0x2e6   :  { %v1054_v22 = vpop.f32.mrf.mxu1 }
 0x2e7   :  { %v1055_v25 = vadd.f32 %v1054_v22, %v1053_v21 }
 0x2e8   :  { %v1056_v23 = vpop.f32.mrf.mxu1 }
 0x2e9   :  { %v1119_v24 = vpop.f32.mrf.mxu0  ;;  %v681_v43 = vadd.f32 %v1055_v25, %v989_v34 }
 0x2ea   :  { %v1057_v26 = vpop.f32.mrf.mxu1 }
 0x2eb   :  { %v1058_v28 = vadd.f32 %v1057_v26, %v1056_v23  ;;  %v726_v31 = vpop.f32.mrf.mxu0 }
 0x2ec   :  { %v1059_v39 = vpop.f32.mrf.mxu1  ;;  %v727_v49 = vadd.f32 %v726_v31, %v678_v45 }
 0x2ed   :  { %v686_v40 = vadd.f32 %v1058_v28, %v989_v34  ;;  %v1120_v41 = vpop.f32.mrf.mxu0 }
 0x2ee   :  { %v1060_v42 = vpop.f32.mrf.mxu1  ;;  %v741_v54 = vadd.f32 %v727_v49, %v294_v38 }
 0x2ef   :  { %v735_v44 = vadd.f32 %v1119_v24, %v686_v40  ;;  %v1061_v46 = vadd.f32 %v1060_v42, %v1059_v39  ;;  %v729_v47 = vpop.f32.mrf.mxu0 }
 0x2f0   :  { %v730_v48 = vadd.f32 %v729_v47, %v681_v43  ;;  %v745_v59 = vmax.f32 %v741_v54, 0.0 }
 0x2f1   :  { %v689_v50 = vadd.f32 %v1061_v46, %v989_v34  ;;  %v743_v53 = vadd.f32 %v735_v44, %v296_v36 }
 0x2f2   :  { %v742_v52 = vadd.f32 %v730_v48, %v295_v35 }
 0x2f3   :  { %v738_v51 = vadd.f32 %v1120_v41, %v689_v50  ;;  %v747_v57 = vmax.f32 %v743_v53, 0.0 }
 0x2f4   :  { %v746_v56 = vmax.f32 %v742_v52, 0.0 }
 0x2f5   :  { %v744_v55 = vadd.f32 %v738_v51, %v297_v37 }
 0x2f6   :  { %v749_v61 = vpack.c.bf16 %v746_v56, %v745_v59 }
 0x2f7   :  { %v748_v58 = vmax.f32 %v744_v55, 0.0 }
 0x2f9   :  { %v750_v60 = vpack.c.bf16 %v748_v58, %v747_v57 }
 0x2fb   :  { %1121 = vmatprep.subr.bf16.mxu0 %v750_v60 }
 0x2fc   :  { %1122 = vmatpush3.bf16.msra.mxu0 %v750_v60 }
 0x2fd   :  { %1123 = vmatprep.subr.bf16.mxu0 %v749_v61 }
 0x300   :  { %1124 = vmatpush3.bf16.msra.mxu0 %v749_v61 }
 0x303   :  { %1126 = vmatmul.mubr.msk.bf16.vlgmr.msra.gmra.mxu0 %vm314_vm1, %v1210_v29 }
 0x3c3   :  { %v1127_v35 = vpop.f32.mrf.mxu0 }
 0x3c5   :  { %v805_v36 = vpop.f32.mrf.mxu0 }
 0x3c6   :  { %v820_v62 = vmax.f32 %v805_v36, %v1127_v35 }
 0x3c7   :  { %v1128_v37 = vpop.f32.mrf.mxu0 }
 0x3c9   :  { %v808_v38 = vpop.f32.mrf.mxu0 }
 0x3ca   :  { %v821_v63 = vmax.f32 %v808_v38, %v1128_v37 }
 0x3cc   :  { %v822_v0 = vpack.c.bf16 %v821_v63, %v820_v62 }
 0x3ce   :  { %1146 = vmatmul.mubr.bf16.vlgmr.msra.gmra.mxu1 %v822_v0 }
 0x48e   :  { %v921_v1 = vpop.f32.mrf.mxu1 }
 0x490   :  { %v1147_v2 = vpop.f32.mrf.mxu1 }
 0x492   :  { %v924_v3 = vpop.f32.mrf.mxu1 }
 0x493   :  { %932 = vrot.lane.b32.xlu0 %v924_v3, %s1370_s30 }
 0x494   :  { %v1148_v4 = vpop.f32.mrf.mxu1 }
 0x497   :  { %930 = vrot.lane.b32.xlu0 %v921_v1, %s1370_s30 }
 0x505   :  { %v933_v5 = vpop.permute.xlu0 %932 }
 0x506   :  { %v937_v6 = vmax.f32 %v924_v3, %v933_v5 }
 0x508   :  { %939 = vrot.lane.b32.xlu1 %v937_v6, %s1370_s30 }
 0x509   :  { %v931_v7 = vpop.permute.xlu0 %930 }
 0x50a   :  { %v936_v8 = vmax.f32 %v921_v1, %v931_v7 }
 0x57a   :  { %v940_v9 = vpop.permute.xlu1 %939 }
 0x57b   :  { %v942_v10 = vsel %vm238_vm0, %v936_v8, %v940_v9 }
 0x57c   :  { %943 = vst [vmem:[#allocation13] sm:$0xff] %v942_v10 }
 0x57d   :  { %1350 = shalt.err (!%p1347_p6)
}
 0x57e   :  { %953 = dma.vmem_to_hbm [thread:$0]  %s951_s15, 128, %s1534_s8, [#allocation4]  }
 0x57f   :  { %1367 = dma.done.wait [#allocation4], 128  }
 0x580   :  { %1368 = vsyncadd [#allocation4], 4294967168 }
 0x581   :  { %957 = vsyncpa [#allocation3], 1 }
 0x582   :  { %958 = vsyncpa [#allocation6], 1 }
 0x583   :  { %959 = vsyncpa [#allocation9], 1 }
 0x584   :  { %960 = vsyncpa [#allocation12], 1 }
 0x585   :  { %961 = vsyncpa [#allocation4], 1 }

</bundles_post_ra>
